<compile_context>
chip_gen: v7x
topology: tpu7x:2x2x1
jax: 0.10.0
libtpu: 0.0.40
codegen_flags: <defaults>
</compile_context>

<pallas_src>
import math

import jax
import jax.numpy as jnp
from jax.experimental import pallas as pl
from jax.experimental.pallas import tpu as pltpu


def _scale_rows_kernel(ss_ref, ut_ref, vr_ref, uo_ref, vo_ref):
    # ss_ref: (T, 1) streamed block  OR  (BRp, 1) VMEM-resident for the grid (f32).
    # ut_ref/uo_ref: (T, M);  vr_ref/vo_ref: (T, N).  Each row i scaled by ss[i].
    t = uo_ref.shape[0]
    if ss_ref.shape[0] == t:                               # streamed per-step block
        ss = ss_ref[...]
    else:                                                  # resident: slice our rows
        start = pl.multiple_of(pl.program_id(0) * t, t)
        ss = ss_ref[pl.ds(start, t), :]
    uo_ref[...] = (ut_ref[...] * ss).astype(uo_ref.dtype)
    vo_ref[...] = (vr_ref[...] * ss).astype(vo_ref.dtype)


def _round_up(x: int, m: int) -> int:
    return ((x + m - 1) // m) * m


def _vmem_capacity_bytes() -> int:
    """Generation-aware VMEM size; conservative default if the query fails."""
    try:
        cap = int(pltpu.get_tpu_info().vmem_capacity_bytes)
        return max(32 << 20, min(cap, 256 << 20))
    except Exception:
        return 64 << 20  # v7x per-TensorCore VMEM (smallest current generation)


def _pick_row_tile(n_rows: int, quantum: int, per_row_hbm: int, per_row_vmem: int,
                   vmem_budget: int, target_step_bytes: int) -> int:
    """Rows per grid step: sublane-dense, big enough to amortize per-step overhead,
    small enough that the double-buffered padded footprint fits the VMEM budget,
    and (when possible) leaving >= 2 grid steps for v7x's two TensorCores."""
    cap_vmem = max(quantum, vmem_budget // (2 * per_row_vmem))
    cap_tgt = max(quantum, target_step_bytes // per_row_hbm)
    t = min(cap_vmem, cap_tgt, _round_up(n_rows, quantum))
    t = max(quantum, (t // quantum) * quantum)
    if t >= n_rows and n_rows > quantum:          # keep >= 2 steps when there is work
        t = max(quantum, _round_up(-(-n_rows // 2), quantum))
    return t


def svd_init(x: jax.Array, rank: int, *, target_step_bytes: int = 16 << 20):
    """Pallas implementation of SVDInit.forward for x of shape (..., M, N)."""
    if x.ndim < 2:
        raise ValueError("expected at least a 2-D matrix")
    *lead, M, N = x.shape
    B = math.prod(lead) if lead else 1
    R = int(rank)
    K = min(M, N)
    if not (1 <= R <= K):
        raise ValueError(f"rank {R} must be in [1, min(M, N) = {K}]")

    x3 = x.reshape(B, M, N)
    # TODO(synk): the SVD (iterative QR/Jacobi eigensolver) has no clean Pallas
    # equivalent; it is computed with jnp.linalg.svd as XLA glue.
    u, s, vh = jnp.linalg.svd(x3, full_matrices=False)  # (B,M,K), (B,K), (B,K,N)

    # Rank-truncate and fold (batch, rank) onto one sublane axis; M/N stay on lanes.
    ut2 = jnp.swapaxes(u[..., :, :R], -1, -2).reshape(B * R, M)   # (B*R, M)
    vr2 = vh[..., :R, :].reshape(B * R, N)                        # (B*R, N)
    ss2 = jnp.sqrt(s[..., :R]).astype(jnp.float32).reshape(B * R, 1)

    BR = B * R
    itemsize = jnp.dtype(x.dtype).itemsize
    quantum = max(8, 32 // itemsize)            # sublane packing: f32 -> 8, bf16 -> 16
    Mp, Np = _round_up(M, 128), _round_up(N, 128)

    vmem_cap = _vmem_capacity_bytes()
    vmem_budget = (3 * vmem_cap) // 8           # ~24 MiB on v7x, ~48 MiB on v5e/v6e
    per_row_hbm = 2 * (M + N) * itemsize + 4                  # read + write + scale
    per_row_vmem = 2 * (Mp + Np) * itemsize                   # in + out slab rows (padded)
    per_row_vmem_streamed = per_row_vmem + 128 * 4            # + streamed sqrt(s) lane-row

    T = _pick_row_tile(BR, quantum, per_row_hbm, per_row_vmem_streamed,
                       vmem_budget, target_step_bytes)
    num_steps = (BR + T - 1) // T
    BRp = num_steps * T

    # Keep sqrt(s) resident across the whole grid when its padded footprint is tiny.
    ss_resident_bytes = BRp * 128 * 4
    resident = ss_resident_bytes <= (1 << 20)
    # Pad only the tiny scale array (in-kernel slice / last block stays in bounds);
    # the big slabs rely on Pallas boundary clipping of the partial last block.
    if BRp != BR:
        ss2 = jnp.pad(ss2, ((0, BRp - BR), (0, 0)))

    if resident:
        ss_spec = pl.BlockSpec((BRp, 1), lambda i: (0, 0))    # fetched once, stays in VMEM
        footprint = 2 * T * per_row_vmem + ss_resident_bytes
    else:
        ss_spec = pl.BlockSpec((T, 1), lambda i: (i, 0))
        footprint = 2 * T * per_row_vmem_streamed

    # Derive the limit from the *padded* double-buffered footprint, capped per chip.
    vmem_limit = int(min(vmem_cap // 2, max(footprint + (2 << 20), 8 << 20)))

    cost = pl.CostEstimate(flops=BR * (M + N), transcendentals=0,
                           bytes_accessed=BR * per_row_hbm)

    uo2, vo2 = pl.pallas_call(
        _scale_rows_kernel,
        out_shape=(
            jax.ShapeDtypeStruct((BR, M), x.dtype),
            jax.ShapeDtypeStruct((BR, N), x.dtype),
        ),
        grid_spec=pltpu.PrefetchScalarGridSpec(
            num_scalar_prefetch=0,
            grid=(num_steps,),
            in_specs=[
                ss_spec,
                pl.BlockSpec((T, M), lambda i: (i, 0)),
                pl.BlockSpec((T, N), lambda i: (i, 0)),
            ],
            out_specs=[
                pl.BlockSpec((T, M), lambda i: (i, 0)),
                pl.BlockSpec((T, N), lambda i: (i, 0)),
            ],
        ),
        compiler_params=pltpu.CompilerParams(
            dimension_semantics=("parallel",),
            vmem_limit_bytes=vmem_limit,
        ),
        cost_estimate=cost,
    )(ss2, ut2, vr2)

    # Back to the module's required output layout (..., M, R) / (..., N, R).
    # Pure XLA plumbing mandated by the contract; fuses with downstream consumers.
    u_out = jnp.swapaxes(uo2.reshape(B, R, M), -1, -2).reshape(*lead, M, R)
    v_out = jnp.swapaxes(vo2.reshape(B, R, N), -1, -2).reshape(*lead, N, R)
    # project == nn.Identity()
    return u_out, v_out


def _reference(x, rank):
    u, s, vh = jnp.linalg.svd(x, full_matrices=False)
    u = u[..., :, :rank]
    sq = jnp.sqrt(s[..., :rank])
    vh = vh[..., :rank, :]
    u_scaled = u * sq[..., None, :]
    v_scaled = jnp.swapaxes(vh, -1, -2) * sq[..., None, :]
    return u_scaled, v_scaled


if __name__ == "__main__":
    key = jax.random.PRNGKey(0)

    # Test 1: small shape matching the module's typical toy usage.
    B, M, N, R = 2, 16, 32, 4
    x = jax.random.normal(key, (B, M, N), dtype=jnp.float32)
    u_out, v_out = svd_init(x, R)
    jax.block_until_ready((u_out, v_out))
    u_ref, v_ref = _reference(x, R)
    assert u_out.shape == (B, M, R) and v_out.shape == (B, N, R)
    assert jnp.allclose(u_out, u_ref, atol=1e-5, rtol=1e-5)
    assert jnp.allclose(v_out, v_ref, atol=1e-5, rtol=1e-5)

    # Test 2: awkward batch*rank (not a multiple of the tile) exercises the
    # cdiv grid, resident sqrt(s) slicing, and partial-last-block clipping.
    key2 = jax.random.PRNGKey(0)
    B2, M2, N2, R2 = 3, 256, 192, 5
    x2 = jax.random.normal(key2, (B2, M2, N2), dtype=jnp.float32)
    u2, v2 = svd_init(x2, R2)
    jax.block_until_ready((u2, v2))
    u2_ref, v2_ref = _reference(x2, R2)
    assert u2.shape == (B2, M2, R2) and v2.shape == (B2, N2, R2)
    assert jnp.allclose(u2, u2_ref, atol=1e-5, rtol=1e-5)
    assert jnp.allclose(v2, v2_ref, atol=1e-5, rtol=1e-5)

    print("KERNEL_OK")
</pallas_src>

<mosaic_0001>
module attributes {stable_mosaic.version = 11 : i64} {
  func.func @_scale_rows_kernel(%arg0: i32, %arg1: memref<8x1xf32, #tpu.memory_space<vmem>>, %arg2: memref<8x16xf32, #tpu.memory_space<vmem>>, %arg3: memref<8x32xf32, #tpu.memory_space<vmem>>, %arg4: memref<8x16xf32, #tpu.memory_space<vmem>>, %arg5: memref<8x32xf32, #tpu.memory_space<vmem>>) attributes {dimension_semantics = [#tpu.dimension_semantics<parallel>], iteration_bounds = array<i64: 1>, scalar_prefetch = 0 : i64, scratch_operands = 0 : i64, tpu.core_type = #tpu.core_type<tc>, window_params = [{pipeline_mode = #tpu.pipeline_mode<synchronous>, transform_indices = @transform_0, window_bounds = array<i64: 8, 1>}, {transform_indices = @transform_1, window_bounds = array<i64: 8, 16>}, {transform_indices = @transform_2, window_bounds = array<i64: 8, 32>}, {transform_indices = @transform_3, window_bounds = array<i64: 8, 16>}, {transform_indices = @transform_4, window_bounds = array<i64: 8, 32>}]} {
    %c0 = arith.constant 0 : index
    %c0_0 = arith.constant 0 : index
    %0 = vector.load %arg1[%c0, %c0_0] : memref<8x1xf32, #tpu.memory_space<vmem>>, vector<8x1xf32>
    %c0_1 = arith.constant 0 : index
    %c0_2 = arith.constant 0 : index
    %1 = vector.load %arg2[%c0_1, %c0_2] : memref<8x16xf32, #tpu.memory_space<vmem>>, vector<8x16xf32>
    %2 = vector.broadcast %0 : vector<8x1xf32> to vector<8x16xf32>
    %3 = arith.mulf %1, %2 : vector<8x16xf32>
    %c0_3 = arith.constant 0 : index
    %c0_4 = arith.constant 0 : index
    %4 = vector.load %arg4[%c0_3, %c0_4] : memref<8x16xf32, #tpu.memory_space<vmem>>, vector<8x16xf32>
    tpu.vector_store %arg4[%c0_3, %c0_4], %3 {strides = array<i32>} : memref<8x16xf32, #tpu.memory_space<vmem>>, vector<8x16xf32>,
    %c0_5 = arith.constant 0 : index
    %c0_6 = arith.constant 0 : index
    %5 = vector.load %arg3[%c0_5, %c0_6] : memref<8x32xf32, #tpu.memory_space<vmem>>, vector<8x32xf32>
    %6 = vector.broadcast %0 : vector<8x1xf32> to vector<8x32xf32>
    %7 = arith.mulf %5, %6 : vector<8x32xf32>
    %c0_7 = arith.constant 0 : index
    %c0_8 = arith.constant 0 : index
    %8 = vector.load %arg5[%c0_7, %c0_8] : memref<8x32xf32, #tpu.memory_space<vmem>>, vector<8x32xf32>
    tpu.vector_store %arg5[%c0_7, %c0_8], %7 {strides = array<i32>} : memref<8x32xf32, #tpu.memory_space<vmem>>, vector<8x32xf32>,
    return
  }
  func.func @transform_0(%arg0: i32) -> (i32, i32) {
    %c0_i32 = arith.constant 0 : i32
    %c0_i32_0 = arith.constant 0 : i32
    %c0_i32_1 = arith.constant 0 : i32
    return %c0_i32, %c0_i32_0 : i32, i32
  }
  func.func @transform_1(%arg0: i32) -> (i32, i32) {
    %c0_i32 = arith.constant 0 : i32
    %c0_i32_0 = arith.constant 0 : i32
    return %arg0, %c0_i32 : i32, i32
  }
  func.func @transform_2(%arg0: i32) -> (i32, i32) {
    %c0_i32 = arith.constant 0 : i32
    %c0_i32_0 = arith.constant 0 : i32
    return %arg0, %c0_i32 : i32, i32
  }
  func.func @transform_3(%arg0: i32) -> (i32, i32) {
    %c0_i32 = arith.constant 0 : i32
    %c0_i32_0 = arith.constant 0 : i32
    return %arg0, %c0_i32 : i32, i32
  }
  func.func @transform_4(%arg0: i32) -> (i32, i32) {
    %c0_i32 = arith.constant 0 : i32
    %c0_i32_0 = arith.constant 0 : i32
    return %arg0, %c0_i32 : i32, i32
  }
}

</mosaic_0001>

<bundles_post_ra>
// kernel: tpu_custom_call.1
= control target key start
LH: loop header
LB: loop body
LE: loop exit
PB: predicated region body
PF: predicated region fallthrough
CT: control target
= control target key end

     0   :  { %10 = vsyncpa [#allocation3], 0  ;;  %v112_v1 = vmov 0   ;;  %s173_s0 = inlined_call_operand.vmem [shape: f32[8,1], index: 0, kind: input, shape index: {}]   ;;  %s174_s1 = inlined_call_operand.vmem [shape: f32[8,16], index: 1, kind: input, shape index: {}]   ;;  %s175_s2 = inlined_call_operand.vmem [shape: f32[8,32], index: 2, kind: input, shape index: {}]   ;;  %s176_s3 = inlined_call_operand.hbm [shape: f32[8,16], index: 3, kind: output, shape index: {0}]   ;;  %s177_s4 = inlined_call_operand.hbm [shape: f32[8,32], index: 4, kind: output, shape index: {1}]  }
   0x1   :  { %v18_v0 = vld [vmem:[%s173_s0] sm:$0xff]  ;;  %63 = vset.pattern.permute.xlu0 %v112_v1 }
   0x2   :  { %11 = vsyncpa [#allocation5], 0  ;;  %22 = vperm.xlu0 %63, %v18_v0   ;;  %v19_v2 = vld [vmem:[%s174_s1] sm:$0xff]  ;;  %s113_s21 = smov [#allocation2]   ;;  %s114_s23 = smov [#allocation4]   ;;  %vm26_vm0 = vcmask 130048  }
   0x3   :  { %v28_v3 = vld [vmem:[%s175_s2] sm:$0xff]  ;;  %s38_s22 = sshll.u32 %s113_s21, 4  ;;  %s48_s24 = sshll.u32 %s114_s23, 4  ;;  %vm30_vm1 = vcmask 261120   ;;  %s39_s22 = int_to_ptr.vmem [resolvable:$true] %s38_s22  ;;  %s49_s24 = int_to_ptr.vmem [resolvable:$true] %s48_s24 }
   0x4   :  { %s64_s0 = scalar_lea.vmem %s39_s22, 128  ;;  %p69_p1 = scmp.lt.s32.totalorder %s39_s22, %s39_s22 }
   0x5   :  { %p65_p0 = scmp.ne.s32.totalorder %s39_s22, %s64_s0  ;;  %p70_p2 = scmp.lt.s32.totalorder %s64_s0, %s64_s0 }
   0x7   :  { %p71_p3 = por %p70_p2, %p69_p1 }
   0x9   :  { %p72_p4 = pnand %p71_p3, %p65_p0 }
  0x81   :  { %v23_v4 = vpop.permute.xlu0 %22 }
  0x82   :  { %v25_v5 = vmul.f32 %v23_v4, %v19_v2  ;;  %v29_v6 = vmul.f32 %v28_v3, %v23_v4 }
  0x84   :  { %27 = vst.msk [vmem:[#allocation2] sm:$0xff] %vm26_vm0, %v25_v5 }
  0x85   :  { %31 = vst.msk [vmem:[#allocation4] sm:$0xff] %vm30_vm1, %v29_v6 }
  0x86   :  { %75 = shalt.err (!%p72_p4)
}
  0x87   :  { %s76_s25 = scalar_lea.hbm %s176_s3, 128 }
  0x88   :  { %p77_p5 = scmp.ne.s32.totalorder %s176_s3, %s76_s25  ;;  %p80_p6 = scmp.lt.u32.totalorder %s76_s25, %s176_s3 }
  0x8a   :  { %p82_p7 = pnand %p80_p6, %p77_p5 }
  0x8c   :  { %85 = shalt.err (!%p82_p7)
}
  0x8d   :  { %41 = dma.vmem_to_hbm [thread:$0]  %s39_s22, 128, %s176_s3, [#allocation3]  }
  0x8e   :  { %s86_s6 = scalar_lea.vmem %s49_s24, 128  ;;  %p91_p9 = scmp.lt.s32.totalorder %s49_s24, %s49_s24 }
  0x8f   :  { %p87_p8 = scmp.ne.s32.totalorder %s49_s24, %s86_s6  ;;  %p92_p10 = scmp.lt.s32.totalorder %s86_s6, %s86_s6 }
  0x91   :  { %p93_p11 = por %p92_p10, %p91_p9 }
  0x93   :  { %p94_p12 = pnand %p93_p11, %p87_p8 }
  0x95   :  { %97 = shalt.err (!%p94_p12)
}
  0x96   :  { %s98_s9 = scalar_lea.hbm %s177_s4, 128 }
  0x97   :  { %p99_p13 = scmp.ne.s32.totalorder %s177_s4, %s98_s9  ;;  %p102_p0 = scmp.lt.u32.totalorder %s98_s9, %s177_s4 }
  0x99   :  { %p104_p1 = pnand %p102_p0, %p99_p13 }
  0x9b   :  { %107 = shalt.err (!%p104_p1)
}
  0x9c   :  { %51 = dma.vmem_to_hbm [thread:$0]  %s49_s24, 128, %s177_s4, [#allocation5]  }
  0x9d   :  { %108 = dma.done.wait [#allocation3], 128  }
  0x9e   :  { %109 = vsyncadd [#allocation3], 4294967168 }
  0x9f   :  { %110 = dma.done.wait [#allocation5], 128  }
  0xa0   :  { %111 = vsyncadd [#allocation5], 4294967168 }
  0xa1   :  { %58 = vsyncpa [#allocation3], 1 }
  0xa2   :  { %59 = vsyncpa [#allocation5], 1 }

</bundles_post_ra>
